<compile_context>
chip_gen: v7x
topology: tpu7x:2x2x1
jax: 0.10.0
libtpu: 0.0.40
codegen_flags: <defaults>
</compile_context>

<pallas_src>
import functools

import jax
import jax.numpy as jnp
from jax.experimental import pallas as pl
from jax.experimental.pallas import tpu as pltpu


def _make_rescnn_kernel(kernel_size: int, padding: int, eps: float,
                        n_real: int, mxu_dtype):
    """Builds the Pallas kernel body (all shape params are static)."""
    inv_n = 1.0 / float(n_real)

    def kernel(x_ref, m_ref, w_ref, ch_ref, o_ref):
        x = x_ref[...]                       # (C, P) f32, lane-dense, zero halos
        maskf = m_ref[...]                   # (1, P) f32: 1.0 on real lanes, 0.0 on halos/tail

        def conv1d(h, layer):
            # h: (C, P) f32 with zero halo lanes.  One bf16 cast, then K shifted
            # MXU dots accumulated in f32 (no im2col concat materialized -> biggest
            # VMEM intermediate removed).  No bias: it cancels under train-mode BN.
            hb = h.astype(mxu_dtype)
            acc = None
            for k in range(kernel_size):
                s = k - padding                                    # static shift
                shifted = hb if s == 0 else jnp.roll(hb, -s, axis=-1)   # XLU rotate
                wk = w_ref[layer * kernel_size + k]                # (Co, Ci), static index
                d = jnp.dot(wk, shifted, preferred_element_type=jnp.float32)
                acc = d if acc is None else acc + d
            return acc                       # (C, P) f32; halo lanes carry garbage

        def bn_relu(h, gamma, beta, zero_halo):
            # training-mode BatchNorm1d: batch stats over (B, L) per channel, biased
            # variance, fused into one scale/shift + ReLU.  Halo/pad lanes are masked
            # out of the statistics (one multiply per layer, replacing the former
            # 2*K per-tap selects).
            hm = h * maskf                                          # (C, P)
            mean = jnp.sum(hm, axis=1, keepdims=True) * inv_n       # (C, 1)
            ex2 = jnp.sum(hm * hm, axis=1, keepdims=True) * inv_n   # (C, 1)
            var = jnp.maximum(ex2 - mean * mean, 0.0)   # clamp: one-pass cancellation
            scale = gamma * jax.lax.rsqrt(var + eps)                # EUP slot
            shift = beta - mean * scale
            y = jnp.maximum(hm * scale + shift, 0.0)
            if zero_halo:
                y = y * maskf    # next conv layer must read zeros in the halo lanes
            return y

        g1, be1 = ch_ref[:, 0:1], ch_ref[:, 1:2]
        g2, be2 = ch_ref[:, 2:3], ch_ref[:, 3:4]

        h = bn_relu(conv1d(x, 0), g1, be1, zero_halo=True)
        h = bn_relu(conv1d(h, 1), g2, be2, zero_halo=False)

        o_ref[...] = x + h       # residual add; halo lanes are discarded by the wrapper

    return kernel


def rescnn_pallas(x, params, *, kernel_size, padding, stride, eps=1e-5,
                  mxu_dtype=jnp.bfloat16):
    assert stride == 1, "residual add requires stride=1 (same output length)"
    assert kernel_size == 2 * padding + 1, "residual add requires a 'same' conv"
    B, C, L = x.shape
    w1, b1, g1, be1, w2, b2, g2, be2 = params
    assert w1.shape == (C, C, kernel_size) and w2.shape == (C, C, kernel_size)
    del b1, b2   # conv biases cancel exactly under train-mode BN; not sent to the kernel

    Lp = L + 2 * padding
    n_lanes = B * Lp
    P = pl.cdiv(n_lanes, 128) * 128          # lane-dense, 128-aligned

    # ---- wrapper-side layout plumbing (no compute hoisting) ----
    # activations: (B,C,L) -> per-sequence zero halos -> (C, B*Lp) -> pad to (C, P)
    xpad = jnp.pad(x.astype(jnp.float32), ((0, 0), (0, 0), (padding, padding)))
    x2d = jnp.transpose(xpad, (1, 0, 2)).reshape(C, n_lanes)
    x2d = jnp.pad(x2d, ((0, 0), (0, P - n_lanes)))
    # TODO(synk): callers that can supply / accept channel-major (C,B,L) data would
    # save the two wrapper transposes (extra HBM round trips for a memory-bound op).

    # mask of real (non-halo, non-tail-pad) lanes
    lane = jnp.arange(P, dtype=jnp.int32)
    j = lane % Lp
    maskf = (((j >= padding) & (j < padding + L) & (lane < n_lanes))
             .astype(jnp.float32).reshape(1, P))

    # weights: (Co, Ci, K) -> (K, Co, Ci), both layers stacked -> (2K, Co, Ci), MXU dtype
    w_packed = jnp.concatenate(
        [jnp.transpose(w1, (2, 0, 1)), jnp.transpose(w2, (2, 0, 1))],
        axis=0).astype(mxu_dtype)

    # per-channel BN params packed into one (C, 4) array: g1, be1, g2, be2
    ch = jnp.stack([g1, be1, g2, be2], axis=1).astype(jnp.float32)

    # VMEM budget for the whole-slab design (x + out + a few f32 intermediates +
    # bf16 copies), with headroom; capped at the smallest per-TC VMEM (v7x: 64 MiB).
    mxu_bytes = jnp.dtype(mxu_dtype).itemsize
    slab = C * P * 4
    est = 5 * slab + 2 * C * P * mxu_bytes + w_packed.size * mxu_bytes + ch.size * 4 + P * 4
    vmem_limit = int(min(max(2 * est, 32 * 1024 * 1024), 64 * 1024 * 1024))
    # TODO(synk): for slabs beyond the per-TC VMEM budget (64 MiB on v7x), tile the
    # lane axis with a "parallel" grid and split each BatchNorm into an accumulate
    # pass (per-channel sum/sumsq partials, pairwise-summed) plus a normalize pass;
    # that also enables DMA/compute overlap and v7x dual-TC use.

    kernel = _make_rescnn_kernel(kernel_size, padding, eps, B * L, mxu_dtype)
    vmem = pl.BlockSpec(memory_space=pltpu.MemorySpace.VMEM)

    out2d = pl.pallas_call(
        kernel,
        out_shape=jax.ShapeDtypeStruct((C, P), jnp.float32),
        in_specs=[vmem, vmem, vmem, vmem],
        out_specs=vmem,
        compiler_params=pltpu.CompilerParams(vmem_limit_bytes=vmem_limit),
    )(x2d, maskf, w_packed, ch)

    out = out2d[:, :n_lanes].reshape(C, B, Lp)[:, :, padding:padding + L]
    return jnp.transpose(out, (1, 0, 2))     # back to (B, C, L)


def rescnn_ref(x, params, *, kernel_size, padding, stride, eps=1e-5):
    """Pure-JAX reference with the PyTorch module's semantics (bias included)."""
    w1, b1, g1, be1, w2, b2, g2, be2 = params
    C = x.shape[1]

    def conv1d(h, w, b):
        hp = jnp.pad(h, ((0, 0), (0, 0), (padding, padding)))
        L = h.shape[2]
        out = b.reshape(1, C, 1).astype(jnp.float32)
        for k in range(kernel_size):
            out = out + jnp.einsum("oi,bil->bol", w[:, :, k], hp[:, :, k:k + L])
        return out

    def bn_relu(h, gamma, beta):
        mean = jnp.mean(h, axis=(0, 2), keepdims=True)
        var = jnp.mean((h - mean) ** 2, axis=(0, 2), keepdims=True)
        hn = (h - mean) / jnp.sqrt(var + eps)
        return jnp.maximum(hn * gamma.reshape(1, C, 1) + beta.reshape(1, C, 1), 0.0)

    h = bn_relu(conv1d(x, w1, b1), g1, be1)
    h = bn_relu(conv1d(h, w2, b2), g2, be2)
    return x + h


if __name__ == "__main__":
    # small shapes consistent with the module's forward: x is [B, C, L],
    # in_channels == out_channels so the residual add is valid.
    B, C, L = 2, 8, 16
    kernel_size, padding, stride = 3, 1, 1

    key = jax.random.PRNGKey(0)
    ks = jax.random.split(key, 9)
    x = jax.random.normal(ks[0], (B, C, L), dtype=jnp.float32)

    w1 = jax.random.normal(ks[1], (C, C, kernel_size), dtype=jnp.float32) * 0.1
    b1 = jax.random.normal(ks[2], (C,), dtype=jnp.float32) * 0.1
    g1 = 1.0 + 0.1 * jax.random.normal(ks[3], (C,), dtype=jnp.float32)
    be1 = 0.1 * jax.random.normal(ks[4], (C,), dtype=jnp.float32)

    w2 = jax.random.normal(ks[5], (C, C, kernel_size), dtype=jnp.float32) * 0.1
    b2 = jax.random.normal(ks[6], (C,), dtype=jnp.float32) * 0.1
    g2 = 1.0 + 0.1 * jax.random.normal(ks[7], (C,), dtype=jnp.float32)
    be2 = 0.1 * jax.random.normal(ks[8], (C,), dtype=jnp.float32)

    params = (w1, b1, g1, be1, w2, b2, g2, be2)

    ref = rescnn_ref(x, params, kernel_size=kernel_size, padding=padding,
                     stride=stride)

    # f32-MXU path: exact-semantics check (tight tolerance).
    run_f32 = jax.jit(functools.partial(rescnn_pallas, kernel_size=kernel_size,
                                        padding=padding, stride=stride,
                                        mxu_dtype=jnp.float32))
    out_f32 = jax.block_until_ready(run_f32(x, params))
    assert out_f32.shape == (B, C, L)
    assert jnp.allclose(out_f32, ref, atol=1e-4, rtol=1e-4), "f32 path mismatch"

    # bf16-MXU path (performance default): f32 accumulation, looser tolerance.
    run_bf16 = jax.jit(functools.partial(rescnn_pallas, kernel_size=kernel_size,
                                         padding=padding, stride=stride,
                                         mxu_dtype=jnp.bfloat16))
    out_bf16 = jax.block_until_ready(run_bf16(x, params))
    assert out_bf16.shape == (B, C, L)
    assert jnp.allclose(out_bf16, ref, atol=3e-2, rtol=3e-2), "bf16 path mismatch"

    print("KERNEL_OK")
</pallas_src>

<mosaic_0001>
module attributes {stable_mosaic.version = 11 : i64} {
  func.func @kernel(%arg0: memref<8x128xf32, #tpu.memory_space<vmem>>, %arg1: memref<1x128xf32, #tpu.memory_space<vmem>>, %arg2: memref<6x8x8xf32, #tpu.memory_space<vmem>>, %arg3: memref<8x4xf32, #tpu.memory_space<vmem>>, %arg4: memref<8x128xf32, #tpu.memory_space<vmem>>) attributes {dimension_semantics = [], scalar_prefetch = 0 : i64, scratch_operands = 0 : i64, tpu.core_type = #tpu.core_type<tc>} {
    %c0 = arith.constant 0 : index
    %c0_0 = arith.constant 0 : index
    %0 = vector.load %arg0[%c0, %c0_0] : memref<8x128xf32, #tpu.memory_space<vmem>>, vector<8x128xf32>
    %c0_1 = arith.constant 0 : index
    %c0_2 = arith.constant 0 : index
    %1 = vector.load %arg1[%c0_1, %c0_2] : memref<1x128xf32, #tpu.memory_space<vmem>>, vector<1x128xf32>
    %c0_3 = arith.constant 0 : index
    %c0_4 = arith.constant 0 : index
    %2 = vector.load %arg3[%c0_3, %c0_4] : memref<8x4xf32, #tpu.memory_space<vmem>>, vector<8x1xf32>
    %c0_5 = arith.constant 0 : index
    %c1 = arith.constant 1 : index
    %3 = vector.load %arg3[%c0_5, %c1] : memref<8x4xf32, #tpu.memory_space<vmem>>, vector<8x1xf32>
    %c0_6 = arith.constant 0 : index
    %c2 = arith.constant 2 : index
    %4 = vector.load %arg3[%c0_6, %c2] : memref<8x4xf32, #tpu.memory_space<vmem>>, vector<8x1xf32>
    %c0_7 = arith.constant 0 : index
    %c3 = arith.constant 3 : index
    %5 = vector.load %arg3[%c0_7, %c3] : memref<8x4xf32, #tpu.memory_space<vmem>>, vector<8x1xf32>
    %6 = vector.extract_strided_slice %0 {offsets = [0, 127], sizes = [8, 1], strides = [1, 1]} : vector<8x128xf32> to vector<8x1xf32>
    %7 = vector.extract_strided_slice %0 {offsets = [0, 0], sizes = [8, 127], strides = [1, 1]} : vector<8x128xf32> to vector<8x127xf32>
    %8 = tpu.concatenate %6, %7 in 1 : vector<8x1xf32>, vector<8x127xf32> -> vector<8x128xf32>
    %c0_8 = arith.constant 0 : index
    %c0_9 = arith.constant 0 : index
    %c0_10 = arith.constant 0 : index
    %9 = vector.load %arg2[%c0_8, %c0_9, %c0_10] : memref<6x8x8xf32, #tpu.memory_space<vmem>>, vector<1x8x8xf32>
    %10 = vector.shape_cast %9 : vector<1x8x8xf32> to vector<8x8xf32>
    %cst = arith.constant dense<0.000000e+00> : vector<8x128xf32>
    %11 = tpu.matmul %10, %8, %cst {dimension_numbers = #tpu.dot_dimension_numbers<[1], [0], [0], [1], [0, 0, 1, 1], [], []>} : vector<8x8xf32>, vector<8x128xf32>, vector<8x128xf32> -> vector<8x128xf32>
    %c1_11 = arith.constant 1 : index
    %c0_12 = arith.constant 0 : index
    %c0_13 = arith.constant 0 : index
    %12 = vector.load %arg2[%c1_11, %c0_12, %c0_13] : memref<6x8x8xf32, #tpu.memory_space<vmem>>, vector<1x8x8xf32>
    %13 = vector.shape_cast %12 : vector<1x8x8xf32> to vector<8x8xf32>
    %cst_14 = arith.constant dense<0.000000e+00> : vector<8x128xf32>
    %14 = tpu.matmul %13, %0, %cst_14 {dimension_numbers = #tpu.dot_dimension_numbers<[1], [0], [0], [1], [0, 0, 1, 1], [], []>} : vector<8x8xf32>, vector<8x128xf32>, vector<8x128xf32> -> vector<8x128xf32>
    %15 = arith.addf %11, %14 : vector<8x128xf32>
    %16 = vector.extract_strided_slice %0 {offsets = [0, 1], sizes = [8, 127], strides = [1, 1]} : vector<8x128xf32> to vector<8x127xf32>
    %17 = vector.extract_strided_slice %0 {offsets = [0, 0], sizes = [8, 1], strides = [1, 1]} : vector<8x128xf32> to vector<8x1xf32>
    %18 = tpu.concatenate %16, %17 in 1 : vector<8x127xf32>, vector<8x1xf32> -> vector<8x128xf32>
    %c2_15 = arith.constant 2 : index
    %c0_16 = arith.constant 0 : index
    %c0_17 = arith.constant 0 : index
    %19 = vector.load %arg2[%c2_15, %c0_16, %c0_17] : memref<6x8x8xf32, #tpu.memory_space<vmem>>, vector<1x8x8xf32>
    %20 = vector.shape_cast %19 : vector<1x8x8xf32> to vector<8x8xf32>
    %cst_18 = arith.constant dense<0.000000e+00> : vector<8x128xf32>
    %21 = tpu.matmul %20, %18, %cst_18 {dimension_numbers = #tpu.dot_dimension_numbers<[1], [0], [0], [1], [0, 0, 1, 1], [], []>} : vector<8x8xf32>, vector<8x128xf32>, vector<8x128xf32> -> vector<8x128xf32>
    %22 = arith.addf %15, %21 : vector<8x128xf32>
    %23 = vector.broadcast %1 : vector<1x128xf32> to vector<8x128xf32>
    %24 = arith.mulf %22, %23 : vector<8x128xf32>
    %cst_19 = arith.constant dense<0.000000e+00> : vector<8xf32>
    %25 = vector.multi_reduction <add>, %24, %cst_19 [1] : vector<8x128xf32> to vector<8xf32>
    %26 = vector.shape_cast %25 : vector<8xf32> to vector<8x1xf32>
    %cst_20 = arith.constant 3.125000e-02 : f32
    %27 = vector.broadcast %cst_20 : f32 to vector<8x1xf32>
    %28 = arith.mulf %26, %27 : vector<8x1xf32>
    %29 = arith.mulf %24, %24 : vector<8x128xf32>
    %cst_21 = arith.constant dense<0.000000e+00> : vector<8xf32>
    %30 = vector.multi_reduction <add>, %29, %cst_21 [1] : vector<8x128xf32> to vector<8xf32>
    %31 = vector.shape_cast %30 : vector<8xf32> to vector<8x1xf32>
    %cst_22 = arith.constant 3.125000e-02 : f32
    %32 = vector.broadcast %cst_22 : f32 to vector<8x1xf32>
    %33 = arith.mulf %31, %32 : vector<8x1xf32>
    %34 = arith.mulf %28, %28 : vector<8x1xf32>
    %35 = arith.subf %33, %34 : vector<8x1xf32>
    %cst_23 = arith.constant 0.000000e+00 : f32
    %36 = vector.broadcast %cst_23 : f32 to vector<8x1xf32>
    %37 = arith.maximumf %35, %36 : vector<8x1xf32>
    %cst_24 = arith.constant 9.99999974E-6 : f32
    %38 = vector.broadcast %cst_24 : f32 to vector<8x1xf32>
    %39 = arith.addf %37, %38 : vector<8x1xf32>
    %40 = math.rsqrt %39 : vector<8x1xf32>
    %41 = arith.mulf %2, %40 : vector<8x1xf32>
    %42 = arith.mulf %28, %41 : vector<8x1xf32>
    %43 = arith.subf %3, %42 : vector<8x1xf32>
    %44 = vector.broadcast %41 : vector<8x1xf32> to vector<8x128xf32>
    %45 = arith.mulf %24, %44 : vector<8x128xf32>
    %46 = vector.broadcast %43 : vector<8x1xf32> to vector<8x128xf32>
    %47 = arith.addf %45, %46 : vector<8x128xf32>
    %cst_25 = arith.constant 0.000000e+00 : f32
    %48 = vector.broadcast %cst_25 : f32 to vector<8x128xf32>
    %49 = arith.maximumf %47, %48 : vector<8x128xf32>
    %50 = vector.broadcast %1 : vector<1x128xf32> to vector<8x128xf32>
    %51 = arith.mulf %49, %50 : vector<8x128xf32>
    %52 = vector.extract_strided_slice %51 {offsets = [0, 127], sizes = [8, 1], strides = [1, 1]} : vector<8x128xf32> to vector<8x1xf32>
    %53 = vector.extract_strided_slice %51 {offsets = [0, 0], sizes = [8, 127], strides = [1, 1]} : vector<8x128xf32> to vector<8x127xf32>
    %54 = tpu.concatenate %52, %53 in 1 : vector<8x1xf32>, vector<8x127xf32> -> vector<8x128xf32>
    %c3_26 = arith.constant 3 : index
    %c0_27 = arith.constant 0 : index
    %c0_28 = arith.constant 0 : index
    %55 = vector.load %arg2[%c3_26, %c0_27, %c0_28] : memref<6x8x8xf32, #tpu.memory_space<vmem>>, vector<1x8x8xf32>
    %56 = vector.shape_cast %55 : vector<1x8x8xf32> to vector<8x8xf32>
    %cst_29 = arith.constant dense<0.000000e+00> : vector<8x128xf32>
    %57 = tpu.matmul %56, %54, %cst_29 {dimension_numbers = #tpu.dot_dimension_numbers<[1], [0], [0], [1], [0, 0, 1, 1], [], []>} : vector<8x8xf32>, vector<8x128xf32>, vector<8x128xf32> -> vector<8x128xf32>
    %c4 = arith.constant 4 : index
    %c0_30 = arith.constant 0 : index
    %c0_31 = arith.constant 0 : index
    %58 = vector.load %arg2[%c4, %c0_30, %c0_31] : memref<6x8x8xf32, #tpu.memory_space<vmem>>, vector<1x8x8xf32>
    %59 = vector.shape_cast %58 : vector<1x8x8xf32> to vector<8x8xf32>
    %cst_32 = arith.constant dense<0.000000e+00> : vector<8x128xf32>
    %60 = tpu.matmul %59, %51, %cst_32 {dimension_numbers = #tpu.dot_dimension_numbers<[1], [0], [0], [1], [0, 0, 1, 1], [], []>} : vector<8x8xf32>, vector<8x128xf32>, vector<8x128xf32> -> vector<8x128xf32>
    %61 = arith.addf %57, %60 : vector<8x128xf32>
    %62 = vector.extract_strided_slice %51 {offsets = [0, 1], sizes = [8, 127], strides = [1, 1]} : vector<8x128xf32> to vector<8x127xf32>
    %63 = vector.extract_strided_slice %51 {offsets = [0, 0], sizes = [8, 1], strides = [1, 1]} : vector<8x128xf32> to vector<8x1xf32>
    %64 = tpu.concatenate %62, %63 in 1 : vector<8x127xf32>, vector<8x1xf32> -> vector<8x128xf32>
    %c5 = arith.constant 5 : index
    %c0_33 = arith.constant 0 : index
    %c0_34 = arith.constant 0 : index
    %65 = vector.load %arg2[%c5, %c0_33, %c0_34] : memref<6x8x8xf32, #tpu.memory_space<vmem>>, vector<1x8x8xf32>
    %66 = vector.shape_cast %65 : vector<1x8x8xf32> to vector<8x8xf32>
    %cst_35 = arith.constant dense<0.000000e+00> : vector<8x128xf32>
    %67 = tpu.matmul %66, %64, %cst_35 {dimension_numbers = #tpu.dot_dimension_numbers<[1], [0], [0], [1], [0, 0, 1, 1], [], []>} : vector<8x8xf32>, vector<8x128xf32>, vector<8x128xf32> -> vector<8x128xf32>
    %68 = arith.addf %61, %67 : vector<8x128xf32>
    %69 = vector.broadcast %1 : vector<1x128xf32> to vector<8x128xf32>
    %70 = arith.mulf %68, %69 : vector<8x128xf32>
    %cst_36 = arith.constant dense<0.000000e+00> : vector<8xf32>
    %71 = vector.multi_reduction <add>, %70, %cst_36 [1] : vector<8x128xf32> to vector<8xf32>
    %72 = vector.shape_cast %71 : vector<8xf32> to vector<8x1xf32>
    %cst_37 = arith.constant 3.125000e-02 : f32
    %73 = vector.broadcast %cst_37 : f32 to vector<8x1xf32>
    %74 = arith.mulf %72, %73 : vector<8x1xf32>
    %75 = arith.mulf %70, %70 : vector<8x128xf32>
    %cst_38 = arith.constant dense<0.000000e+00> : vector<8xf32>
    %76 = vector.multi_reduction <add>, %75, %cst_38 [1] : vector<8x128xf32> to vector<8xf32>
    %77 = vector.shape_cast %76 : vector<8xf32> to vector<8x1xf32>
    %cst_39 = arith.constant 3.125000e-02 : f32
    %78 = vector.broadcast %cst_39 : f32 to vector<8x1xf32>
    %79 = arith.mulf %77, %78 : vector<8x1xf32>
    %80 = arith.mulf %74, %74 : vector<8x1xf32>
    %81 = arith.subf %79, %80 : vector<8x1xf32>
    %cst_40 = arith.constant 0.000000e+00 : f32
    %82 = vector.broadcast %cst_40 : f32 to vector<8x1xf32>
    %83 = arith.maximumf %81, %82 : vector<8x1xf32>
    %cst_41 = arith.constant 9.99999974E-6 : f32
    %84 = vector.broadcast %cst_41 : f32 to vector<8x1xf32>
    %85 = arith.addf %83, %84 : vector<8x1xf32>
    %86 = math.rsqrt %85 : vector<8x1xf32>
    %87 = arith.mulf %4, %86 : vector<8x1xf32>
    %88 = arith.mulf %74, %87 : vector<8x1xf32>
    %89 = arith.subf %5, %88 : vector<8x1xf32>
    %90 = vector.broadcast %87 : vector<8x1xf32> to vector<8x128xf32>
    %91 = arith.mulf %70, %90 : vector<8x128xf32>
    %92 = vector.broadcast %89 : vector<8x1xf32> to vector<8x128xf32>
    %93 = arith.addf %91, %92 : vector<8x128xf32>
    %cst_42 = arith.constant 0.000000e+00 : f32
    %94 = vector.broadcast %cst_42 : f32 to vector<8x128xf32>
    %95 = arith.maximumf %93, %94 : vector<8x128xf32>
    %96 = arith.addf %0, %95 : vector<8x128xf32>
    %c0_43 = arith.constant 0 : index
    %c0_44 = arith.constant 0 : index
    %97 = vector.load %arg4[%c0_43, %c0_44] : memref<8x128xf32, #tpu.memory_space<vmem>>, vector<8x128xf32>
    tpu.vector_store %arg4[%c0_43, %c0_44], %96 {strides = array<i32>} : memref<8x128xf32, #tpu.memory_space<vmem>>, vector<8x128xf32>,
    return
  }
}

</mosaic_0001>

<bundles_post_ra>
// kernel: rescnn_pallas.1
= control target key start
LH: loop header
LB: loop body
LE: loop exit
PB: predicated region body
PF: predicated region fallthrough
CT: control target
= control target key end

     0   :  { %vm27_vm0 = vcmask 64512   ;;  %v644_v1 = vmov 0.0   ;;  %vm645_vm1 = vmmov 0   ;;  %s646_s19 = smov 1   ;;  %v648_v12 = vmov 0   ;;  %s743_s0 = inlined_call_operand.vmem [shape: f32[8,128], index: 0, kind: input, shape index: {}]   ;;  %s744_s2 = inlined_call_operand.vmem [shape: f32[6,8,8], index: 2, kind: input, shape index: {}]   ;;  %s745_s1 = inlined_call_operand.vmem [shape: f32[1,128], index: 1, kind: input, shape index: {}]   ;;  %s746_s3 = inlined_call_operand.vmem [shape: f32[8,4], index: 3, kind: input, shape index: {}]   ;;  %s747_s4 = inlined_call_operand.vmem [shape: f32[8,128], index: 4, kind: output, shape index: {}]  }
   0x1   :  { %v680_v0 = vld [vmem:[%s743_s0] sm:$0xff]  ;;  %589 = vmatprep.subr.mxu0 %v644_v1  ;;  %591 = vmatprep.mubr.msk.f32.mxu0 %vm645_vm1, %v644_v1  ;;  %v565_v2 = vld [vmem:[%s744_s2 + $0x8] sm:$0xff]  ;;  %s647_s0 = smov 127   ;;  %v568_v6 = vld [vmem:[%s744_s2 + $0x10] sm:$0xff]  ;;  %v649_v21 = vmov 1   ;;  %v650_v43 = vmov 2  }
   0x2   :  { %21 = vrot.lane.b32.xlu0 %v680_v0, %s646_s19  ;;  %590 = vmatpush3.msra.mxu0 %v680_v0  ;;  %v24_v3 = vld [vmem:[%s744_s2] sm:$0xff]  ;;  %v571_v35 = vld [vmem:[%s744_s2 + $0x18] sm:$0xff]  ;;  %v575_v38 = vld [vmem:[%s744_s2 + $0x28] sm:$0xff]  ;;  %v651_v52 = vmov 3  }
   0x3   :  { %592 = vmatmul.mubr.msk.f32.vlgmr.msra.gmra.mrb[0].mxu0 %vm27_vm0, %v565_v2  ;;  %594 = vmatprep.subr.mxu0 %v644_v1  ;;  %v570_v7 = vld [vmem:[%s745_s1] ss:$0 sm:$0xff] }
   0x4   :  { %596 = vmatprep.mubr.msk.f32.mxu0 %vm645_vm1, %v644_v1  ;;  %604 = vmatprep.subr.mxu1 %v644_v1  ;;  %v19_v22 = vld [vmem:[%s746_s3] sm:$0xff] }
   0x5   :  { %606 = vmatprep.mubr.msk.f32.mxu1 %vm645_vm1, %v644_v1  ;;  %635 = vset.pattern.permute.xlu1 %v648_v12  ;;  %v572_v34 = vld [vmem:[%s744_s2 + $0x20] sm:$0xff] }
   0x6   :  { %174 = vrot.lane.b32.xlu0 %v680_v0, %s647_s0 }
   0x7   :  { %636 = vset.pattern.permute.xlu0 %v649_v21 }
  0x74   :  { %v22_v4 = vpop.permute.xlu0 %21 }
  0x75   :  { %595 = vmatpush3.msra.mxu0 %v22_v4 }
  0x76   :  { %597 = vmatmul.mubr.msk.f32.vlgmr.msra.gmra.mrb[0].mxu0 %vm27_vm0, %v24_v3  ;;  %599 = vmatprep.subr.mxu0 %v644_v1 }
  0x77   :  { %601 = vmatprep.mubr.msk.f32.mxu0 %vm645_vm1, %v644_v1 }
  0x78   :  { %v175_v5 = vpop.permute.xlu0 %174 }
  0x79   :  { %600 = vmatpush3.msra.mxu0 %v175_v5 }
  0x7e   :  { %602 = vmatmul.mubr.msk.f32.vlgmr.msra.gmra.mrb[0].mxu0 %vm27_vm0, %v568_v6 }
 0x151   :  { %v248_v8 = vpop.f32.mrb[0].mxu0 }
 0x152   :  { %v259_v9 = vmul.f32 %v570_v7, %v248_v8  ;;  %v603_v10 = vpop.f32.mrb[1].mxu0 }
 0x154   :  { %260 = vadd.xlane.f32.xlu1 %v259_v9  ;;  %v263_v11 = vmul.f32 %v259_v9, %v259_v9 }
 0x158   :  { %264 = vadd.xlane.f32.xlu1 %v263_v11 }
 0x1e1   :  { %v261_v13 = vpop.xlane.xlu1 %260 }
 0x1e2   :  { %v262_v14 = vmul.f32 0.03125, %v261_v13 }
 0x1e4   :  { %v267_v16 = vmul.f32 %v262_v14, %v262_v14 }
 0x1e5   :  { %v265_v15 = vpop.xlane.xlu1 %264 }
 0x1e6   :  { %v266_v17 = vmul.f32 0.03125, %v265_v15 }
 0x1e8   :  { %v268_v18 = vsub.f32 %v266_v17, %v267_v16 }
 0x1ea   :  { %v269_v19 = vmax.f32 %v268_v18, 0.0 }
 0x1ec   :  { %v270_v20 = vadd.f32 1e-05, %v269_v19 }
 0x1ee   :  { %640 = vrsqrt.f32 %v270_v20 }
 0x1f8   :  { %v641_v23 = vpop.eup %640 }
 0x1f9   :  { %v272_v24 = vmul.f32 %v641_v23, %v19_v22 }
 0x1fb   :  { %281 = vperm.xlu1 %635, %v272_v24   ;;  %v273_v25 = vmul.f32 %v272_v24, %v262_v14 }
 0x1fd   :  { %275 = vrot.lane.b32.xlu0 %v273_v25, %s646_s19 }
 0x1ff   :  { %637 = vset.pattern.permute.xlu1 %v650_v43 }
 0x26f   :  { %v276_v26 = vpop.permute.xlu0 %275 }
 0x270   :  { %v278_v27 = vsub.f32 %v19_v22, %v276_v26 }
 0x272   :  { %287 = vperm.xlu0 %636, %v278_v27  }
 0x276   :  { %639 = vset.pattern.permute.xlu0 %v651_v52 }
 0x27a   :  { %v282_v28 = vpop.permute.xlu1 %281 }
 0x27b   :  { %v284_v29 = vmul.f32 %v282_v28, %v259_v9 }
 0x2f1   :  { %v288_v30 = vpop.permute.xlu0 %287 }
 0x2f2   :  { %v290_v31 = vadd.f32 %v288_v30, %v284_v29 }
 0x2f4   :  { %v291_v32 = vmax.f32 %v290_v31, 0.0 }
 0x2f6   :  { %v292_v33 = vmul.f32 %v570_v7, %v291_v32 }
 0x2f8   :  { %294 = vrot.lane.b32.xlu0 %v292_v33, %s646_s19  ;;  %605 = vmatpush3.msra.mxu1 %v292_v33 }
 0x2f9   :  { %607 = vmatmul.mubr.msk.f32.vlgmr.msra.gmra.mrb[0].mxu1 %vm27_vm0, %v572_v34  ;;  %609 = vmatprep.subr.mxu1 %v644_v1 }
 0x2fa   :  { %611 = vmatprep.mubr.msk.f32.mxu1 %vm645_vm1, %v644_v1 }
 0x2fc   :  { %447 = vrot.lane.b32.xlu0 %v292_v33, %s647_s0 }
 0x36a   :  { %v295_v36 = vpop.permute.xlu0 %294 }
 0x36b   :  { %610 = vmatpush3.msra.mxu1 %v295_v36 }
 0x36c   :  { %612 = vmatmul.mubr.msk.f32.vlgmr.msra.gmra.mrb[0].mxu1 %vm27_vm0, %v571_v35  ;;  %614 = vmatprep.subr.mxu1 %v644_v1 }
 0x36d   :  { %616 = vmatprep.mubr.msk.f32.mxu1 %vm645_vm1, %v644_v1 }
 0x36e   :  { %v448_v37 = vpop.permute.xlu0 %447 }
 0x36f   :  { %615 = vmatpush3.msra.mxu1 %v448_v37 }
 0x374   :  { %617 = vmatmul.mubr.msk.f32.vlgmr.msra.gmra.mrb[0].mxu1 %vm27_vm0, %v575_v38 }
 0x447   :  { %v521_v39 = vpop.f32.mrb[0].mxu1 }
 0x448   :  { %v526_v40 = vmul.f32 %v570_v7, %v521_v39  ;;  %v618_v41 = vpop.f32.mrb[1].mxu1 }
 0x44a   :  { %527 = vadd.xlane.f32.xlu1 %v526_v40  ;;  %v530_v42 = vmul.f32 %v526_v40, %v526_v40 }
 0x44c   :  { %531 = vadd.xlane.f32.xlu0 %v530_v42 }
 0x4d7   :  { %v528_v44 = vpop.xlane.xlu1 %527 }
 0x4d8   :  { %v529_v45 = vmul.f32 0.03125, %v528_v44 }
 0x4d9   :  { %v532_v46 = vpop.xlane.xlu0 %531 }
 0x4da   :  { %v534_v47 = vmul.f32 %v529_v45, %v529_v45  ;;  %v533_v48 = vmul.f32 0.03125, %v532_v46 }
 0x4dc   :  { %v535_v49 = vsub.f32 %v533_v48, %v534_v47 }
 0x4de   :  { %v536_v50 = vmax.f32 %v535_v49, 0.0 }
 0x4e0   :  { %v537_v51 = vadd.f32 1e-05, %v536_v50 }
 0x4e2   :  { %642 = vrsqrt.f32 %v537_v51 }
 0x4ec   :  { %v643_v53 = vpop.eup %642 }
 0x4ed   :  { %v539_v54 = vmul.f32 %v643_v53, %v19_v22 }
 0x4ef   :  { %548 = vperm.xlu1 %637, %v539_v54   ;;  %v540_v55 = vmul.f32 %v539_v54, %v529_v45 }
 0x4f1   :  { %542 = vrot.lane.b32.xlu0 %v540_v55, %s646_s19 }
 0x4f3   :  { %638 = vset.pattern.permute.xlu1 %v651_v52 }
 0x563   :  { %v543_v56 = vpop.permute.xlu0 %542 }
 0x564   :  { %v545_v57 = vsub.f32 %v19_v22, %v543_v56 }
 0x566   :  { %554 = vperm.xlu1 %638, %v545_v57  }
 0x56e   :  { %v549_v58 = vpop.permute.xlu1 %548 }
 0x56f   :  { %v551_v59 = vmul.f32 %v549_v58, %v526_v40 }
 0x5e5   :  { %v555_v60 = vpop.permute.xlu1 %554 }
 0x5e6   :  { %v557_v61 = vadd.f32 %v555_v60, %v551_v59 }
 0x5e8   :  { %v558_v62 = vmax.f32 %v557_v61, 0.0 }
 0x5ea   :  { %v559_v63 = vadd.f32 %v558_v62, %v680_v0 }
 0x5ec   :  { %560 = vst [vmem:[%s747_s4] sm:$0xff] %v559_v63 }

</bundles_post_ra>
